<compile_context>
chip_gen: v7x
topology: tpu7x:2x2x1
jax: 0.10.0
libtpu: 0.0.40
codegen_flags: <defaults>
</compile_context>

<pallas_src>
import jax
import jax.numpy as jnp
from jax.experimental import pallas as pl
from jax.experimental.pallas import tpu as pltpu


def _decoder_mlp_kernel(x_ref, w1_ref, b1_ref, w2_ref, b2_ref, w3_ref, b3_ref,
                        o_ref):
    # Weights are (in_features, out_features): plain x @ W feeds the MXU
    # natively (lane-dense RHS, no per-step transpose/relayout).
    x = x_ref[...]
    h = jnp.tanh(
        jnp.dot(x, w1_ref[...], preferred_element_type=jnp.float32)
        + b1_ref[...])
    h = jnp.tanh(
        jnp.dot(h, w2_ref[...], preferred_element_type=jnp.float32)
        + b2_ref[...])
    y = jnp.tanh(
        jnp.dot(h, w3_ref[...], preferred_element_type=jnp.float32)
        + b3_ref[...])
    o_ref[...] = y.astype(o_ref.dtype)


def _round_up(a, b):
    return ((a + b - 1) // b) * b


def decoder_net_forward(x, params, m, n, *, row_tile=1024, out_dtype=None):
    """Fused DecoderNet forward: returns (-1, 1, m, n), matching the PyTorch view.

    params = (w1, b1, w2, b2, w3, b3) with weights in (in_features, out_features)
    layout (i.e. the transpose of torch's nn.Linear storage).
    """
    w1, b1, w2, b2, w3, b3 = params
    b = x.shape[-1]
    xf = x.reshape(-1, b)                     # torch: x.view(-1, 1, b) acts on last dim
    N = xf.shape[0]
    mn = m * n
    out_dtype = xf.dtype if out_dtype is None else out_dtype
    assert w1.shape[0] == b and w3.shape[1] == mn

    # Row tile: multiple of 8 (sublane), capped at row_tile, and small enough
    # that large batches get >= 2 grid steps (keeps both v7x TensorCores busy).
    tile = max(8, min(row_tile, _round_up(pl.cdiv(N, 2), 8)))
    n_pad = _round_up(N, tile)
    if n_pad != N:
        xf = jnp.pad(xf, ((0, n_pad - N), (0, 0)))
    grid = n_pad // tile

    y = pl.pallas_call(
        _decoder_mlp_kernel,
        out_shape=jax.ShapeDtypeStruct((n_pad, mn), out_dtype),
        grid=(grid,),
        in_specs=[
            pl.BlockSpec((tile, b), lambda i: (i, 0)),
            # Weights/biases pinned to block (0, 0): fetched once, stay
            # resident in VMEM across the whole grid.
            pl.BlockSpec(w1.shape, lambda i: (0, 0)),
            pl.BlockSpec(b1.shape, lambda i: (0, 0)),
            pl.BlockSpec(w2.shape, lambda i: (0, 0)),
            pl.BlockSpec(b2.shape, lambda i: (0, 0)),
            pl.BlockSpec(w3.shape, lambda i: (0, 0)),
            pl.BlockSpec(b3.shape, lambda i: (0, 0)),
        ],
        out_specs=pl.BlockSpec((tile, mn), lambda i: (i, 0)),
        compiler_params=pltpu.CompilerParams(
            dimension_semantics=("parallel",)),
    )(xf, w1, b1, w2, b2, w3, b3)

    if n_pad != N:
        y = y[:N]
    return y.reshape(-1, 1, m, n)


def decoder_net_ref(x, params, m, n):
    """Plain-JAX reference with identical semantics (torch Linear + tanh)."""
    w1, b1, w2, b2, w3, b3 = params
    xf = x.reshape(-1, x.shape[-1]).astype(jnp.float32)
    h = jnp.tanh(xf @ w1 + b1)
    h = jnp.tanh(h @ w2 + b2)
    y = jnp.tanh(h @ w3 + b3)
    return y.reshape(-1, 1, m, n)


def _xavier_normal_t(key, fan_in, fan_out):
    # Xavier-normal, materialized directly in (in, out) layout (std is
    # symmetric in fan_in/fan_out, so this matches torch's init distribution).
    std = (2.0 / (fan_in + fan_out)) ** 0.5
    return std * jax.random.normal(key, (fan_in, fan_out), dtype=jnp.float32)


def init_decoder_params(key, m, n, b, alpha=1):
    h = 16 * alpha
    mn = m * n
    k1, k2, k3 = jax.random.split(key, 3)
    # Weights in (in_features, out_features); biases 2D (1, out) so the
    # in-kernel add broadcasts over rows cleanly.
    return (
        _xavier_normal_t(k1, b, h),  jnp.zeros((1, h),  jnp.float32),
        _xavier_normal_t(k2, h, h),  jnp.zeros((1, h),  jnp.float32),
        _xavier_normal_t(k3, h, mn), jnp.zeros((1, mn), jnp.float32),
    )


if __name__ == "__main__":
    key = jax.random.PRNGKey(0)
    k_params, k_x, k_x2 = jax.random.split(key, 3)

    m, n, b, ALPHA = 16, 16, 32, 1      # output grid m x n, bottleneck b
    params = init_decoder_params(k_params, m, n, b, ALPHA)

    # Small batch, torch-style (N, 1, b) input.
    x = jax.random.normal(k_x, (8, 1, b), dtype=jnp.float32)
    y = jax.block_until_ready(decoder_net_forward(x, params, m, n))
    y_ref = decoder_net_ref(x, params, m, n)
    assert y.shape == (8, 1, m, n)
    assert jnp.allclose(y, y_ref, atol=1e-5, rtol=1e-5)

    # Larger NON-divisible batch: exercises the cdiv grid + row padding path
    # (>= 2 grid steps, so megacore sharding has work on v7x).
    x2 = jax.random.normal(k_x2, (1000, b), dtype=jnp.float32)
    y2 = jax.block_until_ready(decoder_net_forward(x2, params, m, n))
    y2_ref = decoder_net_ref(x2, params, m, n)
    assert y2.shape == (1000, 1, m, n)
    assert jnp.allclose(y2, y2_ref, atol=1e-5, rtol=1e-5)

    # Optional bf16 output path (halves the dominant HBM writeback stream).
    y3 = jax.block_until_ready(
        decoder_net_forward(x2, params, m, n, out_dtype=jnp.bfloat16))
    assert y3.dtype == jnp.bfloat16
    assert jnp.allclose(y3.astype(jnp.float32), y2_ref, atol=2e-2, rtol=2e-2)

    print("KERNEL_OK")
</pallas_src>

<mosaic_0001>
module attributes {stable_mosaic.version = 11 : i64} {
  func.func @_decoder_mlp_kernel(%arg0: i32, %arg1: memref<8x32xf32, #tpu.memory_space<vmem>>, %arg2: memref<32x16xf32, #tpu.memory_space<vmem>>, %arg3: memref<1x16xf32, #tpu.memory_space<vmem>>, %arg4: memref<16x16xf32, #tpu.memory_space<vmem>>, %arg5: memref<1x16xf32, #tpu.memory_space<vmem>>, %arg6: memref<16x256xf32, #tpu.memory_space<vmem>>, %arg7: memref<1x256xf32, #tpu.memory_space<vmem>>, %arg8: memref<8x256xf32, #tpu.memory_space<vmem>>) attributes {dimension_semantics = [#tpu.dimension_semantics<parallel>], iteration_bounds = array<i64: 1>, scalar_prefetch = 0 : i64, scratch_operands = 0 : i64, tpu.core_type = #tpu.core_type<tc>, window_params = [{transform_indices = @transform_0, window_bounds = array<i64: 8, 32>}, {pipeline_mode = #tpu.pipeline_mode<synchronous>, transform_indices = @transform_1, window_bounds = array<i64: 32, 16>}, {pipeline_mode = #tpu.pipeline_mode<synchronous>, transform_indices = @transform_2, window_bounds = array<i64: 1, 16>}, {pipeline_mode = #tpu.pipeline_mode<synchronous>, transform_indices = @transform_3, window_bounds = array<i64: 16, 16>}, {pipeline_mode = #tpu.pipeline_mode<synchronous>, transform_indices = @transform_4, window_bounds = array<i64: 1, 16>}, {pipeline_mode = #tpu.pipeline_mode<synchronous>, transform_indices = @transform_5, window_bounds = array<i64: 16, 256>}, {pipeline_mode = #tpu.pipeline_mode<synchronous>, transform_indices = @transform_6, window_bounds = array<i64: 1, 256>}, {transform_indices = @transform_7, window_bounds = array<i64: 8, 256>}]} {
    %c0 = arith.constant 0 : index
    %c0_0 = arith.constant 0 : index
    %0 = vector.load %arg1[%c0, %c0_0] : memref<8x32xf32, #tpu.memory_space<vmem>>, vector<8x32xf32>
    %c0_1 = arith.constant 0 : index
    %c0_2 = arith.constant 0 : index
    %1 = vector.load %arg2[%c0_1, %c0_2] : memref<32x16xf32, #tpu.memory_space<vmem>>, vector<32x16xf32>
    %cst = arith.constant dense<0.000000e+00> : vector<8x16xf32>
    %2 = tpu.matmul %0, %1, %cst {dimension_numbers = #tpu.dot_dimension_numbers<[1], [0], [0], [1], [0, 0, 1, 1], [], []>} : vector<8x32xf32>, vector<32x16xf32>, vector<8x16xf32> -> vector<8x16xf32>
    %c0_3 = arith.constant 0 : index
    %c0_4 = arith.constant 0 : index
    %3 = vector.load %arg3[%c0_3, %c0_4] : memref<1x16xf32, #tpu.memory_space<vmem>>, vector<1x16xf32>
    %4 = vector.broadcast %3 : vector<1x16xf32> to vector<8x16xf32>
    %5 = arith.addf %2, %4 : vector<8x16xf32>
    %6 = math.tanh %5 : vector<8x16xf32>
    %c0_5 = arith.constant 0 : index
    %c0_6 = arith.constant 0 : index
    %7 = vector.load %arg4[%c0_5, %c0_6] : memref<16x16xf32, #tpu.memory_space<vmem>>, vector<16x16xf32>
    %cst_7 = arith.constant dense<0.000000e+00> : vector<8x16xf32>
    %8 = tpu.matmul %6, %7, %cst_7 {dimension_numbers = #tpu.dot_dimension_numbers<[1], [0], [0], [1], [0, 0, 1, 1], [], []>} : vector<8x16xf32>, vector<16x16xf32>, vector<8x16xf32> -> vector<8x16xf32>
    %c0_8 = arith.constant 0 : index
    %c0_9 = arith.constant 0 : index
    %9 = vector.load %arg5[%c0_8, %c0_9] : memref<1x16xf32, #tpu.memory_space<vmem>>, vector<1x16xf32>
    %10 = vector.broadcast %9 : vector<1x16xf32> to vector<8x16xf32>
    %11 = arith.addf %8, %10 : vector<8x16xf32>
    %12 = math.tanh %11 : vector<8x16xf32>
    %c0_10 = arith.constant 0 : index
    %c0_11 = arith.constant 0 : index
    %13 = vector.load %arg6[%c0_10, %c0_11] : memref<16x256xf32, #tpu.memory_space<vmem>>, vector<16x256xf32>
    %cst_12 = arith.constant dense<0.000000e+00> : vector<8x256xf32>
    %14 = tpu.matmul %12, %13, %cst_12 {dimension_numbers = #tpu.dot_dimension_numbers<[1], [0], [0], [1], [0, 0, 1, 1], [], []>} : vector<8x16xf32>, vector<16x256xf32>, vector<8x256xf32> -> vector<8x256xf32>
    %c0_13 = arith.constant 0 : index
    %c0_14 = arith.constant 0 : index
    %15 = vector.load %arg7[%c0_13, %c0_14] : memref<1x256xf32, #tpu.memory_space<vmem>>, vector<1x256xf32>
    %16 = vector.broadcast %15 : vector<1x256xf32> to vector<8x256xf32>
    %17 = arith.addf %14, %16 : vector<8x256xf32>
    %18 = math.tanh %17 : vector<8x256xf32>
    %c0_15 = arith.constant 0 : index
    %c0_16 = arith.constant 0 : index
    %19 = vector.load %arg8[%c0_15, %c0_16] : memref<8x256xf32, #tpu.memory_space<vmem>>, vector<8x256xf32>
    tpu.vector_store %arg8[%c0_15, %c0_16], %18 {strides = array<i32>} : memref<8x256xf32, #tpu.memory_space<vmem>>, vector<8x256xf32>,
    return
  }
  func.func @transform_0(%arg0: i32) -> (i32, i32) {
    %c0_i32 = arith.constant 0 : i32
    %c0_i32_0 = arith.constant 0 : i32
    return %arg0, %c0_i32 : i32, i32
  }
  func.func @transform_1(%arg0: i32) -> (i32, i32) {
    %c0_i32 = arith.constant 0 : i32
    %c0_i32_0 = arith.constant 0 : i32
    %c0_i32_1 = arith.constant 0 : i32
    return %c0_i32, %c0_i32_0 : i32, i32
  }
  func.func @transform_2(%arg0: i32) -> (i32, i32) {
    %c0_i32 = arith.constant 0 : i32
    %c0_i32_0 = arith.constant 0 : i32
    %c0_i32_1 = arith.constant 0 : i32
    return %c0_i32, %c0_i32_0 : i32, i32
  }
  func.func @transform_3(%arg0: i32) -> (i32, i32) {
    %c0_i32 = arith.constant 0 : i32
    %c0_i32_0 = arith.constant 0 : i32
    %c0_i32_1 = arith.constant 0 : i32
    return %c0_i32, %c0_i32_0 : i32, i32
  }
  func.func @transform_4(%arg0: i32) -> (i32, i32) {
    %c0_i32 = arith.constant 0 : i32
    %c0_i32_0 = arith.constant 0 : i32
    %c0_i32_1 = arith.constant 0 : i32
    return %c0_i32, %c0_i32_0 : i32, i32
  }
  func.func @transform_5(%arg0: i32) -> (i32, i32) {
    %c0_i32 = arith.constant 0 : i32
    %c0_i32_0 = arith.constant 0 : i32
    %c0_i32_1 = arith.constant 0 : i32
    return %c0_i32, %c0_i32_0 : i32, i32
  }
  func.func @transform_6(%arg0: i32) -> (i32, i32) {
    %c0_i32 = arith.constant 0 : i32
    %c0_i32_0 = arith.constant 0 : i32
    %c0_i32_1 = arith.constant 0 : i32
    return %c0_i32, %c0_i32_0 : i32, i32
  }
  func.func @transform_7(%arg0: i32) -> (i32, i32) {
    %c0_i32 = arith.constant 0 : i32
    %c0_i32_0 = arith.constant 0 : i32
    return %arg0, %c0_i32 : i32, i32
  }
}

</mosaic_0001>

<bundles_post_ra>
// kernel: tpu_custom_call.1
= control target key start
LH: loop header
LB: loop body
LE: loop exit
PB: predicated region body
PF: predicated region fallthrough
CT: control target
= control target key end

     0   :  { %v386_v3 = vmov 0.0|0.0   ;;  %vm387_vm0 = vmmov 0   ;;  %v388_v6 = vmov 0.0   ;;  %s486_s0 = inlined_call_operand.vmem [shape: f32[8,32], index: 0, kind: input, shape index: {}]   ;;  %s487_s1 = inlined_call_operand.vmem [shape: f32[32,16], index: 1, kind: input, shape index: {}]   ;;  %s488_s2 = inlined_call_operand.vmem [shape: f32[1,16], index: 2, kind: input, shape index: {}]   ;;  %s489_s3 = inlined_call_operand.vmem [shape: f32[16,16], index: 3, kind: input, shape index: {}]   ;;  %s490_s4 = inlined_call_operand.vmem [shape: f32[1,16], index: 4, kind: input, shape index: {}]   ;;  %s491_s5 = inlined_call_operand.vmem [shape: f32[16,256], index: 5, kind: input, shape index: {}]   ;;  %s492_s6 = inlined_call_operand.vmem [shape: f32[1,256], index: 6, kind: input, shape index: {}]   ;;  %s493_s7 = inlined_call_operand.hbm [shape: f32[8,256], index: 7, kind: output, shape index: {}]  }
   0x1   :  { %v28_v0 = vld [vmem:[%s487_s1] sm:$0xff]  ;;  %v29_v1 = vld [vmem:[%s487_s1 + $0x8] sm:$0xff]  ;;  %v30_v2 = vld [vmem:[%s487_s1 + $0x10] sm:$0xff]  ;;  %337 = vmatprep.subr.bf16.mxu0 %v386_v3  ;;  %327 = vmatprep.mubr.msk.f32.mxu0 %vm387_vm0, %v388_v6 }
   0x2   :  { %v338_v4 = vpack.c.bf16 %v29_v1, %v28_v0  ;;  %v31_v5 = vld [vmem:[%s487_s1 + $0x18] sm:$0xff]  ;;  %343 = vmatprep.subr.bf16.mxu1 %v386_v3  ;;  %334 = vmatprep.mubr.msk.f32.mxu1 %vm387_vm0, %v388_v6 }
   0x3   :  { %12 = vsyncpa [#allocation3], 0  ;;  %v341_v7 = vpack.c.bf16 %v31_v5, %v30_v2  ;;  %v27_v8 = vld [vmem:[%s486_s0] sm:$0xff]  ;;  %vm39_vm1 = vcmask 261120   ;;  %v115_v10 = vld [vmem:[%s489_s3 + $0x8] sm:$0xff]  ;;  %vm123_vm2 = vcmask 130048   ;;  %v204_v28 = vlaneseq }
   0x4   :  { %339 = vmatpush3.bf16.msra.mxu0 %v338_v4  ;;  %v114_v9 = vld [vmem:[%s489_s3] sm:$0xff]  ;;  %v199_v17 = vld [vmem:[%s491_s5 + $0x8] sm:$0xff]  ;;  %v201_v18 = vld [vmem:[%s491_s5 + $0x18] sm:$0xff] }
   0x5   :  { %340 = vmatprep.subr.bf16.mxu0 %v386_v3  ;;  %v344_v11 = vpack.c.bf16 %v115_v10, %v114_v9  ;;  %v306_v12 = vld [vmem:[%s488_s2] ss:$0 sm:$0xff]  ;;  %v346_v20 = vpack.c.bf16 %v201_v18, %v199_v17  ;;  %v200_v21 = vld [vmem:[%s491_s5 + $0x10] sm:$0xff]  ;;  %v205_v29 = vshrl.u32 %v204_v28, 7 }
   0x6   :  { %v198_v19 = vld [vmem:[%s491_s5] sm:$0xff] }
   0x7   :  { %345 = vmatpush3.bf16.msra.mxu1 %v344_v11  ;;  %v348_v22 = vpack.c.bf16 %v200_v21, %v198_v19  ;;  %v308_v23 = vld [vmem:[%s490_s4] ss:$0 sm:$0xff]  ;;  %v206_v30 = vsub.s32 0, %v205_v29  ;;  %v210_v32 = vsub.s32 1, %v205_v29  ;;  %s389_s4 = smov [#allocation2]  }
   0x8   :  { %342 = vmatpush3.bf16.msra.mxu0 %v341_v7  ;;  %347 = vmatprep.subr.bf16.mxu1 %v346_v20  ;;  %v202_v31 = vld [vmem:[%s492_s6] sm:$0x3]  ;;  %s298_s5 = sshll.u32 %s389_s4, 4  ;;  %s299_s5 = int_to_ptr.vmem [resolvable:$true] %s298_s5 }
   0x9   :  { %v207_v33 = vrot.slane %v202_v31, %v206_v30  ;;  %v211_v34 = vrot.slane %v202_v31, %v210_v32  ;;  %s362_s25 = scalar_lea.vmem %s299_s5, 256  ;;  %p367_p1 = scmp.lt.s32.totalorder %s299_s5, %s299_s5 }
   0xa   :  { %p363_p0 = scmp.ne.s32.totalorder %s299_s5, %s362_s25  ;;  %p368_p2 = scmp.lt.s32.totalorder %s362_s25, %s362_s25 }
   0xb   :  { %328 = vmatmul.mubr.msk.f32.vlgmr.msra.gmra.mrb[0].mxu0 %vm39_vm1, %v27_v8 }
   0xc   :  { %p369_p3 = por %p368_p2, %p367_p1 }
   0xe   :  { %p370_p4 = pnand %p369_p3, %p363_p0 }
  0xde   :  { %v109_v13 = vpop.f32.mrb[0].mxu0 }
  0xdf   :  { %v110_v14 = vadd.f32 %v306_v12, %v109_v13  ;;  %v329_v15 = vpop.f32.mrb[1].mxu0 }
  0xe1   :  { %354 = vtanh.f32 %v110_v14 }
  0xeb   :  { %v355_v16 = vpop.eup %354 }
  0xec   :  { %335 = vmatmul.mubr.msk.f32.vlgmr.msra.gmra.mrb[0].mxu1 %vm123_vm2, %v355_v16 }
  0xed   :  { %281 = vmatprep.mubr.f32.mxu1 %v388_v6  ;;  %349 = vmatpush1.bf16.msra.mxu1 %v348_v22 }
 0x1bf   :  { %v193_v24 = vpop.f32.mrb[0].mxu1 }
 0x1c0   :  { %v194_v25 = vadd.f32 %v308_v23, %v193_v24  ;;  %v336_v26 = vpop.f32.mrb[1].mxu1 }
 0x1c2   :  { %356 = vtanh.f32 %v194_v25 }
 0x1cc   :  { %v357_v27 = vpop.eup %356 }
 0x1cd   :  { %310 = vmatmul.mubr.msk.f32.vlgmr.msra.gmra.mrb[2].mxu1 %vm123_vm2, %v357_v27 }
 0x2a0   :  { %v283_v35 = vpop.f32.mrb[2].mxu1 }
 0x2a1   :  { %v284_v36 = vadd.f32 %v283_v35, %v207_v33  ;;  %v285_v37 = vpop.f32.mrb[3].mxu1 }
 0x2a2   :  { %v286_v38 = vadd.f32 %v285_v37, %v211_v34 }
 0x2a3   :  { %358 = vtanh.f32 %v284_v36 }
 0x2a4   :  { %360 = vtanh.f32 %v286_v38 }
 0x2ad   :  { %v359_v39 = vpop.eup %358 }
 0x2ae   :  { %v361_v40 = vpop.eup %360  ;;  %290 = vst [vmem:[#allocation2] sm:$0xff] %v359_v39 }
 0x2af   :  { %291 = vst [vmem:[#allocation2 + $0x8] sm:$0xff] %v361_v40 }
 0x2b0   :  { %373 = shalt.err (!%p370_p4)
}
 0x2b1   :  { %s374_s27 = scalar_lea.hbm %s493_s7, 256 }
 0x2b2   :  { %p375_p5 = scmp.ne.s32.totalorder %s493_s7, %s374_s27  ;;  %p378_p6 = scmp.lt.u32.totalorder %s374_s27, %s493_s7 }
 0x2b4   :  { %p380_p7 = pnand %p378_p6, %p375_p5 }
 0x2b6   :  { %383 = shalt.err (!%p380_p7)
}
 0x2b7   :  { %301 = dma.vmem_to_hbm [thread:$0]  %s299_s5, 256, %s493_s7, [#allocation3]  }
 0x2b8   :  { %384 = dma.done.wait [#allocation3], 256  }
 0x2b9   :  { %385 = vsyncadd [#allocation3], 4294967040 }
 0x2ba   :  { %305 = vsyncpa [#allocation3], 1 }

</bundles_post_ra>
